<compile_context>
chip_gen: v7x
topology: tpu7x:2x2x1
jax: 0.10.0
libtpu: 0.0.40
codegen_flags: <defaults>
</compile_context>

<pallas_src>
import math
from functools import partial

import numpy as np
import jax
import jax.numpy as jnp
from jax.experimental import pallas as pl
from jax.experimental.pallas import tpu as pltpu

STD = 1.0  # normal_kernel default std
_NEG_BIG = -1e30                     # "minus infinity" for padded support cols
_VMEM_BUDGET = 20 * 1024 * 1024      # working-set budget (safe on v5e/v6e/v7x)
_VMEM_LIMIT = 32 * 1024 * 1024       # scoped VMEM limit handed to Mosaic


def _round_up(v, m):
    return (v + m - 1) // m * m


def _vmem_footprint(tn, tm, d_pad, c_pad):
    """Approx VMEM bytes: double-buffered blocks + scratch + (TN,TM) temps."""
    inputs = 2 * (tn * d_pad         # x tile
                  + tn * 128         # ||x||^2 (lane-padded to 128)
                  + tm * d_pad       # x_a^T tile
                  + 8 * tm           # ||x_a||^2 (sublane-padded to 8)
                  + tm * c_pad)      # p_dy (+ ones column)
    outputs = 2 * tn * c_pad
    scratch = tn * c_pad + tn * 128  # acc + running row max
    temps = 3 * tn * tm              # gram / exponent / exp live simultaneously
    return 4 * (inputs + outputs + scratch + temps)


def _semisup_kernel(x_ref, xsq_ref, xat_ref, xasq_ref, pdy_ref, out_ref,
                    acc_ref, m_ref, *, num_classes):
    """One (TILE_N x TILE_M) block of the kernel-density classifier.

    x_ref    : (TN, Dp)     query tile (f32)
    xsq_ref  : (TN, 1)      precomputed  -0.5*||x||^2/std^2
    xat_ref  : (Dp, TM)     support tile, pre-transposed and scaled by 1/std^2
    xasq_ref : (1, TM)      precomputed  -0.5*||x_a||^2/std^2  (padded cols -1e30)
    pdy_ref  : (TM, C_pad)  class distribution; col `num_classes` is all ones
                            (row-sum fusion); padded rows/cols are zero
    out_ref  : (TN, C_pad)  written only on the last M step
    acc_ref  : (TN, C_pad)  f32 accumulator, persists across the M grid axis
    m_ref    : (TN, 1)      running row max of the exponent (flash-style shift)
    """
    mj = pl.program_id(1)

    @pl.when(mj == 0)
    def _init():
        acc_ref[...] = jnp.zeros_like(acc_ref)
        m_ref[...] = jnp.full_like(m_ref, -jnp.inf)

    # exponent[i, j] = -0.5 * ||x_i - x_a_j||^2 / std^2 via the Gram identity.
    # All scaling folded into the precomputed terms; only one MXU matmul plus
    # two adds + clamp on the (TN, TM) tile.
    gram = jnp.dot(x_ref[...], xat_ref[...],
                   preferred_element_type=jnp.float32)             # (TN, TM)
    exponent = jnp.minimum(xsq_ref[...] + xasq_ref[...] + gram, 0.0)

    # Running row-max shift: exp(m) cancels exactly in acc / p_x, so this is
    # semantically identical to the reference but robust to underflow.
    m_new = jnp.maximum(m_ref[...],
                        jnp.max(exponent, axis=-1, keepdims=True))  # (TN, 1)
    alpha = jnp.exp(m_ref[...] - m_new)                             # (TN, 1)
    p = jnp.exp(exponent - m_new)                                   # (TN, TM)

    # Second MXU matmul: cols [0, C) accumulate p_xy, col C accumulates p_x
    # (ones column); padded cols stay zero.
    acc_ref[...] = alpha * acc_ref[...] + jnp.dot(
        p, pdy_ref[...], preferred_element_type=jnp.float32)
    m_ref[...] = m_new

    @pl.when(mj == pl.num_programs(1) - 1)
    def _finalize():
        acc = acc_ref[...]
        p_x = acc[:, num_classes:num_classes + 1]                   # (TN, 1)
        out_ref[...] = acc / p_x


def semisup_forward(x, x_a, p_dy, std=STD, tile_n=512, tile_m=512):
    """P[y | x] for the semi-supervised kernel classifier."""
    N, D = x.shape
    M, C = p_dy.shape
    assert x_a.shape == (M, D)

    scale = -0.5 / (std * std)
    inv_std2 = 1.0 / (std * std)

    # Lane-dense paddings: classes (+ ones col) and features up to 128.
    c_aug = C + 1
    c_pad = _round_up(c_aug, 128)
    d_pad = _round_up(D, 128)
    n128 = _round_up(N, 128)
    m128 = _round_up(M, 128)

    # ---- tile selection ----------------------------------------------------
    tile_n = min(_round_up(tile_n, 128), n128)
    # v7x has 2 TensorCores; make sure the "parallel" N axis has >= 2 steps
    # when there is enough work (prefer a split that adds no padded rows).
    if n128 // tile_n == 1 and n128 >= 256:
        tile_n = max(128, (n128 // 2) // 128 * 128)

    # Keep the whole support set resident (M axis collapses to one step) when
    # it fits the VMEM budget; otherwise shrink tile_m (then tile_n) by 128s.
    if _vmem_footprint(tile_n, m128, d_pad, c_pad) <= _VMEM_BUDGET:
        tile_m = m128
    else:
        tile_m = min(_round_up(tile_m, 128), m128)
        while tile_m > 128 and _vmem_footprint(tile_n, tile_m, d_pad, c_pad) > _VMEM_BUDGET:
            tile_m -= 128
        while tile_n > 128 and _vmem_footprint(tile_n, tile_m, d_pad, c_pad) > _VMEM_BUDGET:
            tile_n -= 128

    n_pad = _round_up(N, tile_n)
    m_pad = _round_up(M, tile_m)

    # ---- wrapper-side precompute (done once, off the hot loop) -------------
    x_p = jnp.pad(x.astype(jnp.float32), ((0, n_pad - N), (0, d_pad - D)))
    xa_p = jnp.pad(x_a.astype(jnp.float32), ((0, m_pad - M), (0, d_pad - D)))

    # -0.5*||x||^2/std^2 per query row (avoids a per-M-step XLU reduction).
    x_sq = (scale * jnp.sum(x_p * x_p, axis=-1, keepdims=True))     # (n_pad, 1)
    # -0.5*||x_a||^2/std^2 per support row; padded rows get -1e30 so they can
    # never dominate the running row max (their p_dy rows are zero anyway).
    xa_sq = scale * jnp.sum(xa_p * xa_p, axis=-1)                   # (m_pad,)
    xa_sq = jnp.where(jnp.arange(m_pad) < M, xa_sq, _NEG_BIG)[None, :]
    # 1/std^2 folded into the support matrix; pre-transposed so the in-kernel
    # MXU contraction needs no XLU transpose.
    xa_t = (xa_p * inv_std2).T                                      # (d_pad, m_pad)

    # p_dy augmented with a ones column (fuses K.sum(-1) into the MXU matmul)
    # and padded to a lane-dense class width; padded support rows are zero.
    p_dy_aug = jnp.concatenate(
        [p_dy.astype(jnp.float32), jnp.ones((M, 1), jnp.float32)], axis=1)
    pdy_p = jnp.pad(p_dy_aug, ((0, m_pad - M), (0, c_pad - c_aug)))

    grid = (n_pad // tile_n, m_pad // tile_m)

    out = pl.pallas_call(
        partial(_semisup_kernel, num_classes=C),
        out_shape=jax.ShapeDtypeStruct((n_pad, c_pad), jnp.float32),
        grid=grid,
        in_specs=[
            pl.BlockSpec((tile_n, d_pad), lambda i, j: (i, 0)),     # x
            pl.BlockSpec((tile_n, 1), lambda i, j: (i, 0)),         # -.5||x||^2/std^2
            pl.BlockSpec((d_pad, tile_m), lambda i, j: (0, j)),     # x_a^T/std^2
            pl.BlockSpec((1, tile_m), lambda i, j: (0, j)),         # -.5||xa||^2/std^2
            pl.BlockSpec((tile_m, c_pad), lambda i, j: (j, 0)),     # p_dy (+ones)
        ],
        out_specs=pl.BlockSpec((tile_n, c_pad), lambda i, j: (i, 0)),
        scratch_shapes=[pltpu.VMEM((tile_n, c_pad), jnp.float32),   # acc
                        pltpu.VMEM((tile_n, 1), jnp.float32)],      # running max
        compiler_params=pltpu.CompilerParams(
            dimension_semantics=("parallel", "arbitrary"),
            vmem_limit_bytes=_VMEM_LIMIT),
    )(x_p, x_sq, xa_t, xa_sq, pdy_p)
    return out[:N, :C]


def build_p_dy(y_l, s_u, num_classes):
    """Module glue (parameter_values + cat) in plain JAX."""
    pyl = jax.nn.one_hot(y_l, num_classes, dtype=jnp.float32)       # (M_l, C)
    pyu = jax.nn.softmax(s_u, axis=-1)                              # (M_u, C)
    return jnp.concatenate([pyl, pyu], axis=0)                      # (M, C)


def reference_forward(x, x_a, p_dy, std=STD):
    """Pure-jnp reference mirroring the PyTorch forward."""
    ak = x[:, None, :] / std
    kb = x_a[None, :, :] / std
    K = jnp.exp(-0.5 * jnp.sum((ak - kb) ** 2, axis=-1)) / (std * (2 * math.pi) ** 0.5)
    p_xy = jnp.matmul(K, p_dy, precision=jax.lax.Precision.HIGHEST)
    p_x = jnp.sum(K, axis=-1, keepdims=True)
    return p_xy / p_x


if __name__ == "__main__":
    key = jax.random.PRNGKey(0)
    k_xl, k_xu, k_yl, k_x, k_big = jax.random.split(key, 5)

    # --- Small problem matching the module's toy setup ----------------------
    D, M_l, M_u, C, N = 32, 8, 8, 4, 8
    x_l = jax.random.normal(k_xl, (M_l, D), dtype=jnp.float32)
    x_u = jax.random.normal(k_xu, (M_u, D), dtype=jnp.float32)
    y_l = jax.random.randint(k_yl, (M_l,), 0, C, dtype=jnp.int32)
    x = jax.random.normal(k_x, (N, D), dtype=jnp.float32)

    # Module __init__ semantics: x_a = cat([x_l, x_u]); s_u = zeros((M_u, C)).
    x_a = jnp.concatenate([x_l, x_u], axis=0)
    s_u = jnp.zeros((M_u, C), dtype=jnp.float32)
    p_dy = build_p_dy(y_l, s_u, C)

    out = jax.block_until_ready(semisup_forward(x, x_a, p_dy))
    ref = reference_forward(x, x_a, p_dy)
    np.testing.assert_allclose(np.asarray(out), np.asarray(ref),
                               rtol=5e-3, atol=1e-6)

    # --- Larger problem exercising tiling / padding / multi-step N axis -----
    N2, M2, D2, C2, std2 = 300, 600, 96, 5, 3.0
    ks = jax.random.split(k_big, 3)
    x2 = jax.random.normal(ks[0], (N2, D2), dtype=jnp.float32)
    xa2 = jax.random.normal(ks[1], (M2, D2), dtype=jnp.float32)
    p_dy2 = jax.nn.softmax(jax.random.normal(ks[2], (M2, C2), jnp.float32), -1)

    out2 = jax.block_until_ready(semisup_forward(x2, xa2, p_dy2, std=std2))
    ref2 = reference_forward(x2, xa2, p_dy2, std=std2)
    np.testing.assert_allclose(np.asarray(out2), np.asarray(ref2),
                               rtol=5e-3, atol=1e-6)

    # --- Far-from-support queries: reference would underflow-NaN; the
    #     flash-style row-max shift keeps the kernel finite and normalized.
    x_far = x2 + 200.0
    out3 = jax.block_until_ready(semisup_forward(x_far, xa2, p_dy2, std=1.0))
    assert np.all(np.isfinite(np.asarray(out3)))
    np.testing.assert_allclose(np.asarray(out3).sum(-1), 1.0, rtol=1e-4)

    print("KERNEL_OK")
</pallas_src>

<mosaic_0001>
module attributes {stable_mosaic.version = 11 : i64} {
  func.func @_semisup_kernel(%arg0: i32, %arg1: i32, %arg2: memref<128x128xf32, #tpu.memory_space<vmem>>, %arg3: memref<128x1xf32, #tpu.memory_space<vmem>>, %arg4: memref<128x128xf32, #tpu.memory_space<vmem>>, %arg5: memref<1x128xf32, #tpu.memory_space<vmem>>, %arg6: memref<128x128xf32, #tpu.memory_space<vmem>>, %arg7: memref<128x128xf32, #tpu.memory_space<vmem>>, %arg8: memref<128x128xf32, #tpu.memory_space<vmem>>, %arg9: memref<128x1xf32, #tpu.memory_space<vmem>>) attributes {dimension_semantics = [#tpu.dimension_semantics<parallel>, #tpu.dimension_semantics<arbitrary>], iteration_bounds = array<i64: 1, 1>, scalar_prefetch = 0 : i64, scratch_operands = 2 : i64, tpu.core_type = #tpu.core_type<tc>, window_params = [{transform_indices = @transform_0, window_bounds = array<i64: 128, 128>}, {transform_indices = @transform_1, window_bounds = array<i64: 128, 1>}, {transform_indices = @transform_2, window_bounds = array<i64: 128, 128>}, {transform_indices = @transform_3, window_bounds = array<i64: 1, 128>}, {transform_indices = @transform_4, window_bounds = array<i64: 128, 128>}, {transform_indices = @transform_5, window_bounds = array<i64: 128, 128>}]} {
    %c0_i32 = arith.constant 0 : i32
    %0 = arith.cmpi eq, %arg1, %c0_i32 : i32
    %1 = arith.extui %0 : i1 to i32
    %c0_i32_0 = arith.constant 0 : i32
    %2 = arith.cmpi ne, %1, %c0_i32_0 : i32
    scf.if %2 {
      %cst_25 = arith.constant 0.000000e+00 : f32
      %35 = vector.broadcast %cst_25 : f32 to vector<128x128xf32>
      %c0_26 = arith.constant 0 : index
      %c0_27 = arith.constant 0 : index
      %36 = vector.load %arg8[%c0_26, %c0_27] : memref<128x128xf32, #tpu.memory_space<vmem>>, vector<128x128xf32>
      tpu.vector_store %arg8[%c0_26, %c0_27], %35 {strides = array<i32>} : memref<128x128xf32, #tpu.memory_space<vmem>>, vector<128x128xf32>,
      %cst_28 = arith.constant 0xFF800000 : f32
      %37 = vector.broadcast %cst_28 : f32 to vector<128x1xf32>
      %c0_29 = arith.constant 0 : index
      %c0_30 = arith.constant 0 : index
      %38 = vector.load %arg9[%c0_29, %c0_30] : memref<128x1xf32, #tpu.memory_space<vmem>>, vector<128x1xf32>
      tpu.vector_store %arg9[%c0_29, %c0_30], %37 {strides = array<i32>} : memref<128x1xf32, #tpu.memory_space<vmem>>, vector<128x1xf32>,
    } else {
    }
    %c0 = arith.constant 0 : index
    %c0_1 = arith.constant 0 : index
    %3 = vector.load %arg2[%c0, %c0_1] : memref<128x128xf32, #tpu.memory_space<vmem>>, vector<128x128xf32>
    %c0_2 = arith.constant 0 : index
    %c0_3 = arith.constant 0 : index
    %4 = vector.load %arg4[%c0_2, %c0_3] : memref<128x128xf32, #tpu.memory_space<vmem>>, vector<128x128xf32>
    %cst = arith.constant dense<0.000000e+00> : vector<128x128xf32>
    %5 = tpu.matmul %3, %4, %cst {dimension_numbers = #tpu.dot_dimension_numbers<[1], [0], [0], [1], [0, 0, 1, 1], [], []>} : vector<128x128xf32>, vector<128x128xf32>, vector<128x128xf32> -> vector<128x128xf32>
    %c0_4 = arith.constant 0 : index
    %c0_5 = arith.constant 0 : index
    %6 = vector.load %arg3[%c0_4, %c0_5] : memref<128x1xf32, #tpu.memory_space<vmem>>, vector<128x1xf32>
    %c0_6 = arith.constant 0 : index
    %c0_7 = arith.constant 0 : index
    %7 = vector.load %arg5[%c0_6, %c0_7] : memref<1x128xf32, #tpu.memory_space<vmem>>, vector<1x128xf32>
    %8 = vector.broadcast %6 : vector<128x1xf32> to vector<128x128xf32>
    %9 = vector.broadcast %7 : vector<1x128xf32> to vector<128x128xf32>
    %10 = arith.addf %8, %9 : vector<128x128xf32>
    %11 = arith.addf %10, %5 : vector<128x128xf32>
    %cst_8 = arith.constant 0.000000e+00 : f32
    %12 = vector.broadcast %cst_8 : f32 to vector<128x128xf32>
    %13 = arith.minimumf %11, %12 : vector<128x128xf32>
    %c0_9 = arith.constant 0 : index
    %c0_10 = arith.constant 0 : index
    %14 = vector.load %arg9[%c0_9, %c0_10] : memref<128x1xf32, #tpu.memory_space<vmem>>, vector<128x1xf32>
    %cst_11 = arith.constant dense<0xFF800000> : vector<128xf32>
    %15 = vector.multi_reduction <maximumf>, %13, %cst_11 [1] : vector<128x128xf32> to vector<128xf32>
    %16 = vector.shape_cast %15 : vector<128xf32> to vector<128x1xf32>
    %17 = arith.maximumf %14, %16 : vector<128x1xf32>
    %c0_12 = arith.constant 0 : index
    %c0_13 = arith.constant 0 : index
    %18 = vector.load %arg9[%c0_12, %c0_13] : memref<128x1xf32, #tpu.memory_space<vmem>>, vector<128x1xf32>
    %19 = arith.subf %18, %17 : vector<128x1xf32>
    %20 = math.exp %19 : vector<128x1xf32>
    %21 = vector.broadcast %17 : vector<128x1xf32> to vector<128x128xf32>
    %22 = arith.subf %13, %21 : vector<128x128xf32>
    %23 = math.exp %22 : vector<128x128xf32>
    %c0_14 = arith.constant 0 : index
    %c0_15 = arith.constant 0 : index
    %24 = vector.load %arg8[%c0_14, %c0_15] : memref<128x128xf32, #tpu.memory_space<vmem>>, vector<128x128xf32>
    %25 = vector.broadcast %20 : vector<128x1xf32> to vector<128x128xf32>
    %26 = arith.mulf %25, %24 : vector<128x128xf32>
    %c0_16 = arith.constant 0 : index
    %c0_17 = arith.constant 0 : index
    %27 = vector.load %arg6[%c0_16, %c0_17] : memref<128x128xf32, #tpu.memory_space<vmem>>, vector<128x128xf32>
    %cst_18 = arith.constant dense<0.000000e+00> : vector<128x128xf32>
    %28 = tpu.matmul %23, %27, %cst_18 {dimension_numbers = #tpu.dot_dimension_numbers<[1], [0], [0], [1], [0, 0, 1, 1], [], []>} : vector<128x128xf32>, vector<128x128xf32>, vector<128x128xf32> -> vector<128x128xf32>
    %29 = arith.addf %26, %28 : vector<128x128xf32>
    %c0_19 = arith.constant 0 : index
    %c0_20 = arith.constant 0 : index
    %30 = vector.load %arg8[%c0_19, %c0_20] : memref<128x128xf32, #tpu.memory_space<vmem>>, vector<128x128xf32>
    tpu.vector_store %arg8[%c0_19, %c0_20], %29 {strides = array<i32>} : memref<128x128xf32, #tpu.memory_space<vmem>>, vector<128x128xf32>,
    %c0_21 = arith.constant 0 : index
    %c0_22 = arith.constant 0 : index
    %31 = vector.load %arg9[%c0_21, %c0_22] : memref<128x1xf32, #tpu.memory_space<vmem>>, vector<128x1xf32>
    tpu.vector_store %arg9[%c0_21, %c0_22], %17 {strides = array<i32>} : memref<128x1xf32, #tpu.memory_space<vmem>>, vector<128x1xf32>,
    %c0_i32_23 = arith.constant 0 : i32
    %32 = arith.cmpi eq, %arg1, %c0_i32_23 : i32
    %33 = arith.extui %32 : i1 to i32
    %c0_i32_24 = arith.constant 0 : i32
    %34 = arith.cmpi ne, %33, %c0_i32_24 : i32
    scf.if %34 {
      %c0_25 = arith.constant 0 : index
      %c0_26 = arith.constant 0 : index
      %35 = vector.load %arg8[%c0_25, %c0_26] : memref<128x128xf32, #tpu.memory_space<vmem>>, vector<128x128xf32>
      %36 = vector.extract_strided_slice %35 {offsets = [0, 4], sizes = [128, 1], strides = [1, 1]} : vector<128x128xf32> to vector<128x1xf32>
      %37 = vector.broadcast %36 : vector<128x1xf32> to vector<128x128xf32>
      %38 = arith.divf %35, %37 : vector<128x128xf32>
      %c0_27 = arith.constant 0 : index
      %c0_28 = arith.constant 0 : index
      %39 = vector.load %arg7[%c0_27, %c0_28] : memref<128x128xf32, #tpu.memory_space<vmem>>, vector<128x128xf32>
      tpu.vector_store %arg7[%c0_27, %c0_28], %38 {strides = array<i32>} : memref<128x128xf32, #tpu.memory_space<vmem>>, vector<128x128xf32>,
    } else {
    }
    return
  }
  func.func @transform_0(%arg0: i32, %arg1: i32) -> (i32, i32) {
    %c0_i32 = arith.constant 0 : i32
    %c0_i32_0 = arith.constant 0 : i32
    return %arg0, %c0_i32 : i32, i32
  }
  func.func @transform_1(%arg0: i32, %arg1: i32) -> (i32, i32) {
    %c0_i32 = arith.constant 0 : i32
    %c0_i32_0 = arith.constant 0 : i32
    return %arg0, %c0_i32 : i32, i32
  }
  func.func @transform_2(%arg0: i32, %arg1: i32) -> (i32, i32) {
    %c0_i32 = arith.constant 0 : i32
    %c0_i32_0 = arith.constant 0 : i32
    return %c0_i32, %arg1 : i32, i32
  }
  func.func @transform_3(%arg0: i32, %arg1: i32) -> (i32, i32) {
    %c0_i32 = arith.constant 0 : i32
    %c0_i32_0 = arith.constant 0 : i32
    return %c0_i32, %arg1 : i32, i32
  }
  func.func @transform_4(%arg0: i32, %arg1: i32) -> (i32, i32) {
    %c0_i32 = arith.constant 0 : i32
    %c0_i32_0 = arith.constant 0 : i32
    return %arg1, %c0_i32 : i32, i32
  }
  func.func @transform_5(%arg0: i32, %arg1: i32) -> (i32, i32) {
    %c0_i32 = arith.constant 0 : i32
    %c0_i32_0 = arith.constant 0 : i32
    return %arg0, %c0_i32 : i32, i32
  }
}

</mosaic_0001>

<bundles_post_ra>
// kernel: tpu_custom_call.1
= control target key start
LH: loop header
LB: loop body
LE: loop exit
PB: predicated region body
PF: predicated region fallthrough
CT: control target
= control target key end

     0   :  { %10 = vsyncpa [#allocation5], 0  ;;  %s2071_s0 = inlined_call_operand.vmem [shape: f32[128,128], index: 0, kind: input, shape index: {}]   ;;  %s2072_s1 = inlined_call_operand.vmem [shape: f32[128,1], index: 1, kind: input, shape index: {}]   ;;  %s2073_s2 = inlined_call_operand.hbm [shape: f32[128,128], index: 2, kind: input, shape index: {}]   ;;  %s2074_s3 = inlined_call_operand.vmem [shape: f32[1,128], index: 3, kind: input, shape index: {}]   ;;  %s2075_s4 = inlined_call_operand.hbm [shape: f32[128,128], index: 4, kind: input, shape index: {}]   ;;  %s2076_s5 = inlined_call_operand.hbm [shape: f32[128,128], index: 5, kind: output, shape index: {}]  }
   0x1   :  { %11 = vsyncpa [#allocation8], 0 }
   0x2   :  { %12 = vsyncpa [#allocation6], 0  ;;  %s1562_s18 = smov [#allocation4]   ;;  %s1490_s22 = scalar_lea.hbm %s2073_s2, 2048 }
   0x3   :  { %s22_s19 = sshll.u32 %s1562_s18, 4  ;;  %p1491_p0 = scmp.ne.s32.totalorder %s2073_s2, %s1490_s22  ;;  %s23_s19 = int_to_ptr.vmem [resolvable:$true] %s22_s19 }
   0x4   :  { %p1494_p1 = scmp.lt.u32.totalorder %s1490_s22, %s2073_s2 }
   0x6   :  { %p1496_p2 = pnand %p1494_p1, %p1491_p0 }
   0x8   :  { %1499 = shalt.err (!%p1496_p2)
}
   0x9   :  { %s1500_s27 = scalar_lea.vmem %s23_s19, 2048  ;;  %p1505_p4 = scmp.lt.s32.totalorder %s23_s19, %s23_s19 }
   0xa   :  { %p1501_p3 = scmp.ne.s32.totalorder %s23_s19, %s1500_s27  ;;  %p1506_p5 = scmp.lt.s32.totalorder %s1500_s27, %s1500_s27 }
   0xc   :  { %p1507_p6 = por %p1506_p5, %p1505_p4 }
   0xe   :  { %p1508_p7 = pnand %p1507_p6, %p1501_p3 }
  0x10   :  { %1511 = shalt.err (!%p1508_p7)
}
  0x11   :  { %s1563_s28 = smov 128   ;;  %s1564_s29 = smov 8  }
  0x12   :  { %28 = dma.hbm_to_vmem [thread:$0]  %s2073_s2, 2048, %s23_s19, [#allocation5], %s1563_s28, %s1563_s28, %s1564_s29  }
  0x13   :  { %s1565_s7 = smov [#allocation7]   ;;  %s1512_s11 = scalar_lea.hbm %s2075_s4, 2048 }
  0x14   :  { %s36_s8 = sshll.u32 %s1565_s7, 4  ;;  %p1513_p8 = scmp.ne.s32.totalorder %s2075_s4, %s1512_s11  ;;  %s37_s8 = int_to_ptr.vmem [resolvable:$true] %s36_s8 }
  0x15   :  { %p1516_p9 = scmp.lt.u32.totalorder %s1512_s11, %s2075_s4 }
  0x17   :  { %p1518_p10 = pnand %p1516_p9, %p1513_p8 }
  0x19   :  { %1521 = shalt.err (!%p1518_p10)
}
  0x1a   :  { %s1522_s16 = scalar_lea.vmem %s37_s8, 2048  ;;  %p1527_p12 = scmp.lt.s32.totalorder %s37_s8, %s37_s8 }
  0x1b   :  { %p1523_p11 = scmp.ne.s32.totalorder %s37_s8, %s1522_s16  ;;  %p1528_p13 = scmp.lt.s32.totalorder %s1522_s16, %s1522_s16 }
  0x1d   :  { %p1529_p0 = por %p1528_p13, %p1527_p12 }
  0x1f   :  { %p1530_p1 = pnand %p1529_p0, %p1523_p11 }
  0x21   :  { %1533 = shalt.err (!%p1530_p1)
}
  0x22   :  { %42 = dma.hbm_to_vmem [thread:$0]  %s2075_s4, 2048, %s37_s8, [#allocation8], %s1563_s28, %s1563_s28, %s1564_s29  }
  0x23   :  { %1556 = dma.done.wait [#allocation5], 2048  }
  0x24   :  { %1557 = vsyncadd [#allocation5], 4294965248 }
  0x25   :  { %1558 = dma.done.wait [#allocation8], 2048  }
  0x26   :  { %1559 = vsyncadd [#allocation8], 4294965248  ;;  %v1566_v0 = vmov 0   ;;  %v102_v1 = vld [vmem:[#allocation4] sm:$0xff]  ;;  %v103_v2 = vld [vmem:[#allocation4 + $0x8] sm:$0xff]  ;;  %vm69_vm0 = vcmask 7168  }
  0x27   :  { %1390 = vset.pattern.permute.xlu0 %v1566_v0  ;;  %1391 = vset.pattern.permute.xlu1 %v1566_v0  ;;  %v104_v3 = vld [vmem:[#allocation4 + $0x10] sm:$0xff]  ;;  %v1318_v4 = vpack.c.bf16 %v103_v2, %v102_v1  ;;  %v105_v5 = vld [vmem:[#allocation4 + $0x18] sm:$0xff]  ;;  %v106_v7 = vld [vmem:[#allocation4 + $0x20] sm:$0xff]  ;;  %v1567_v57 = vmov -inf  }
  0x28   :  { %v1322_v6 = vpack.c.bf16 %v105_v5, %v104_v3  ;;  %v107_v8 = vld [vmem:[#allocation4 + $0x28] sm:$0xff]  ;;  %v86_v10 = vld [vmem:[%s2071_s0] sm:$0xff]  ;;  %v108_v11 = vld [vmem:[#allocation4 + $0x30] sm:$0xff]  ;;  %71 = vst.msk [vmem:[#allocation3 + $0x8] sm:$0xff] %vm69_vm0, %v1567_v57 }
  0x29   :  { %1319 = vmatprep.subr.bf16.mxu0 %v1318_v4  ;;  %v1326_v9 = vpack.c.bf16 %v107_v8, %v106_v7  ;;  %v109_v12 = vld [vmem:[#allocation4 + $0x38] sm:$0xff]  ;;  %1238 = vmatprep.mubr.f32.mxu0 %v86_v10  ;;  %v110_v14 = vld [vmem:[#allocation4 + $0x40] sm:$0xff]  ;;  %v111_v15 = vld [vmem:[#allocation4 + $0x48] sm:$0xff]  ;;  %70 = vst.msk [vmem:[#allocation3] sm:$0xff] %vm69_vm0, %v1567_v57 }
  0x2a   :  { %1321 = vmatpush3.bf16.msra.mxu0 %v1318_v4  ;;  %v1330_v13 = vpack.c.bf16 %v109_v12, %v108_v11  ;;  %v263_v16 = vld [vmem:[%s2072_s1] sm:$0xff]  ;;  %v265_v17 = vld [vmem:[%s2072_s1 + $0x10] sm:$0xff]  ;;  %v264_v18 = vld [vmem:[%s2072_s1 + $0x8] sm:$0xff]  ;;  %v1334_v19 = vpack.c.bf16 %v111_v15, %v110_v14  ;;  %72 = vst.msk [vmem:[#allocation3 + $0x10] sm:$0xff] %vm69_vm0, %v1567_v57 }
  0x2b   :  { %1323 = vmatprep.subr.bf16.mxu0 %v1322_v6  ;;  %282 = vperm.xlu0 %1390, %v263_v16   ;;  %v266_v20 = vld [vmem:[%s2072_s1 + $0x18] sm:$0xff]  ;;  %v112_v21 = vld [vmem:[#allocation4 + $0x50] sm:$0xff]  ;;  %v267_v23 = vld [vmem:[%s2072_s1 + $0x20] sm:$0xff]  ;;  %73 = vst.msk [vmem:[#allocation3 + $0x18] sm:$0xff] %vm69_vm0, %v1567_v57 }
  0x2c   :  { %292 = vperm.xlu1 %1391, %v265_v17   ;;  %v113_v22 = vld [vmem:[#allocation4 + $0x58] sm:$0xff]  ;;  %v268_v25 = vld [vmem:[%s2072_s1 + $0x28] sm:$0xff]  ;;  %v114_v26 = vld [vmem:[#allocation4 + $0x60] sm:$0xff]  ;;  %74 = vst.msk [vmem:[#allocation3 + $0x20] sm:$0xff] %vm69_vm0, %v1567_v57 }
  0x2d   :  { %v1338_v24 = vpack.c.bf16 %v113_v22, %v112_v21  ;;  %v115_v27 = vld [vmem:[#allocation4 + $0x68] sm:$0xff]  ;;  %v269_v28 = vld [vmem:[%s2072_s1 + $0x30] sm:$0xff]  ;;  %v270_v30 = vld [vmem:[%s2072_s1 + $0x38] sm:$0xff]  ;;  %75 = vst.msk [vmem:[#allocation3 + $0x28] sm:$0xff] %vm69_vm0, %v1567_v57 }
  0x2e   :  { %1325 = vmatpush3.bf16.msra.mxu0 %v1322_v6  ;;  %v1342_v29 = vpack.c.bf16 %v115_v27, %v114_v26  ;;  %v116_v31 = vld [vmem:[#allocation4 + $0x70] sm:$0xff]  ;;  %v117_v32 = vld [vmem:[#allocation4 + $0x78] sm:$0xff]  ;;  %v271_v33 = vld [vmem:[%s2072_s1 + $0x40] sm:$0xff]  ;;  %76 = vst.msk [vmem:[#allocation3 + $0x30] sm:$0xff] %vm69_vm0, %v1567_v57 }
  0x2f   :  { %1327 = vmatprep.subr.bf16.mxu0 %v1326_v9  ;;  %287 = vperm.xlu0 %1390, %v264_v18   ;;  %v1346_v34 = vpack.c.bf16 %v117_v32, %v116_v31  ;;  %v272_v35 = vld [vmem:[%s2072_s1 + $0x48] sm:$0xff]  ;;  %v273_v36 = vld [vmem:[%s2072_s1 + $0x50] sm:$0xff]  ;;  %v274_v37 = vld [vmem:[%s2072_s1 + $0x58] sm:$0xff]  ;;  %77 = vst.msk [vmem:[#allocation3 + $0x38] sm:$0xff] %vm69_vm0, %v1567_v57 }
  0x30   :  { %297 = vperm.xlu1 %1391, %v266_v20   ;;  %v87_v38 = vld [vmem:[%s2071_s0 + $0x8] sm:$0xff]  ;;  %v275_v39 = vld [vmem:[%s2072_s1 + $0x60] sm:$0xff]  ;;  %v88_v40 = vld [vmem:[%s2071_s0 + $0x10] sm:$0xff]  ;;  %78 = vst.msk [vmem:[#allocation3 + $0x40] sm:$0xff] %vm69_vm0, %v1567_v57 }
  0x31   :  { %v276_v41 = vld [vmem:[%s2072_s1 + $0x68] sm:$0xff]  ;;  %v89_v42 = vld [vmem:[%s2071_s0 + $0x18] sm:$0xff]  ;;  %v277_v43 = vld [vmem:[%s2072_s1 + $0x70] sm:$0xff]  ;;  %79 = vst.msk [vmem:[#allocation3 + $0x48] sm:$0xff] %vm69_vm0, %v1567_v57 }
  0x32   :  { %1329 = vmatpush3.bf16.msra.mxu0 %v1326_v9  ;;  %v90_v44 = vld [vmem:[%s2071_s0 + $0x20] sm:$0xff]  ;;  %v278_v45 = vld [vmem:[%s2072_s1 + $0x78] sm:$0xff]  ;;  %v91_v46 = vld [vmem:[%s2071_s0 + $0x28] sm:$0xff]  ;;  %80 = vst.msk [vmem:[#allocation3 + $0x50] sm:$0xff] %vm69_vm0, %v1567_v57 }
  0x33   :  { %1331 = vmatprep.subr.bf16.mxu0 %v1330_v13  ;;  %302 = vperm.xlu0 %1390, %v267_v23   ;;  %v92_v47 = vld [vmem:[%s2071_s0 + $0x30] sm:$0xff]  ;;  %v93_v48 = vld [vmem:[%s2071_s0 + $0x38] sm:$0xff]  ;;  %v94_v49 = vld [vmem:[%s2071_s0 + $0x40] sm:$0xff]  ;;  %81 = vst.msk [vmem:[#allocation3 + $0x58] sm:$0xff] %vm69_vm0, %v1567_v57 }
  0x34   :  { %307 = vperm.xlu1 %1391, %v268_v25   ;;  %v95_v50 = vld [vmem:[%s2071_s0 + $0x48] sm:$0xff]  ;;  %v96_v51 = vld [vmem:[%s2071_s0 + $0x50] sm:$0xff]  ;;  %v97_v52 = vld [vmem:[%s2071_s0 + $0x58] sm:$0xff]  ;;  %82 = vst.msk [vmem:[#allocation3 + $0x60] sm:$0xff] %vm69_vm0, %v1567_v57 }
  0x35   :  { %v98_v53 = vld [vmem:[%s2071_s0 + $0x60] sm:$0xff]  ;;  %v99_v54 = vld [vmem:[%s2071_s0 + $0x68] sm:$0xff]  ;;  %v100_v55 = vld [vmem:[%s2071_s0 + $0x70] sm:$0xff]  ;;  %83 = vst.msk [vmem:[#allocation3 + $0x68] sm:$0xff] %vm69_vm0, %v1567_v57 }
  0x36   :  { %1333 = vmatpush3.bf16.msra.mxu0 %v1330_v13  ;;  %v101_v56 = vld [vmem:[%s2071_s0 + $0x78] sm:$0xff]  ;;  %84 = vst.msk [vmem:[#allocation3 + $0x70] sm:$0xff] %vm69_vm0, %v1567_v57  ;;  %85 = vst.msk [vmem:[#allocation3 + $0x78] sm:$0xff] %vm69_vm0, %v1567_v57  ;;  %v1745_v62 = vld [vmem:[%s2074_s3] ss:$0 sm:$0xff]  ;;  %s1569_s3 = smov [#allocation9]  }
  0x37   :  { %1335 = vmatprep.subr.bf16.mxu0 %v1334_v19  ;;  %312 = vperm.xlu0 %1390, %v269_v28   ;;  %s1128_s8 = sshll.u32 %s1569_s3, 4  ;;  %s1129_s8 = int_to_ptr.vmem [resolvable:$true] %s1128_s8 }
  0x38   :  { %317 = vperm.xlu1 %1391, %v270_v30   ;;  %s1534_s9 = scalar_lea.vmem %s1129_s8, 2048  ;;  %p1539_p3 = scmp.lt.s32.totalorder %s1129_s8, %s1129_s8 }
  0x39   :  { %p1535_p2 = scmp.ne.s32.totalorder %s1129_s8, %s1534_s9  ;;  %p1540_p4 = scmp.lt.s32.totalorder %s1534_s9, %s1534_s9 }
  0x3a   :  { %1337 = vmatpush3.bf16.msra.mxu0 %v1334_v19 }
  0x3b   :  { %1339 = vmatprep.subr.bf16.mxu0 %v1338_v24  ;;  %322 = vperm.xlu0 %1390, %v271_v33   ;;  %p1541_p5 = por %p1540_p4, %p1539_p3 }
  0x3c   :  { %327 = vperm.xlu1 %1391, %v272_v35  }
  0x3d   :  { %p1542_p6 = pnand %p1541_p5, %p1535_p2 }
  0x3e   :  { %1341 = vmatpush3.bf16.msra.mxu0 %v1338_v24 }
  0x3f   :  { %1343 = vmatprep.subr.bf16.mxu0 %v1342_v29  ;;  %332 = vperm.xlu0 %1390, %v273_v36  }
  0x40   :  { %337 = vperm.xlu1 %1391, %v274_v37  }
  0x42   :  { %1345 = vmatpush3.bf16.msra.mxu0 %v1342_v29 }
  0x43   :  { %1347 = vmatprep.subr.bf16.mxu0 %v1346_v34  ;;  %342 = vperm.xlu0 %1390, %v275_v39  }
  0x44   :  { %347 = vperm.xlu1 %1391, %v276_v41  }
  0x46   :  { %1349 = vmatpush3.bf16.msra.mxu0 %v1346_v34 }
  0x47   :  { %352 = vperm.xlu0 %1390, %v277_v43  }
  0x48   :  { %357 = vperm.xlu1 %1391, %v278_v45  }
  0x49   :  { %1239 = vmatmul.mubr.f32.vlgmr.msra.gmra.mrb[0].mxu0 %v87_v38 }
  0x4a   :  { %1241 = vmatprep.mubr.f32.mxu0 %v88_v40 }
  0x4d   :  { %1242 = vmatmul.mubr.f32.gmra.mrb[2].mxu0 %v89_v42 }
  0x4e   :  { %1244 = vmatprep.mubr.f32.mxu0 %v90_v44 }
  0x51   :  { %1245 = vmatmul.mubr.f32.gmra.mrb[4].mxu0 %v91_v46 }
  0x52   :  { %1247 = vmatprep.mubr.f32.mxu0 %v92_v47 }
  0x55   :  { %1248 = vmatmul.mubr.f32.gmra.mrb[6].mxu0 %v93_v48 }
  0x56   :  { %1250 = vmatprep.mubr.f32.mxu0 %v94_v49 }
  0x59   :  { %1251 = vmatmul.mubr.f32.gmra.mrb[8].mxu0 %v95_v50 }
  0x5a   :  { %1253 = vmatprep.mubr.f32.mxu0 %v96_v51 }
  0x5d   :  { %1254 = vmatmul.mubr.f32.gmra.mrb[10].mxu0 %v97_v52 }
  0x5e   :  { %1256 = vmatprep.mubr.f32.mxu0 %v98_v53 }
  0x61   :  { %1257 = vmatmul.mubr.f32.gmra.mrb[12].mxu0 %v99_v54 }
  0x62   :  { %1259 = vmatprep.mubr.f32.mxu0 %v100_v55 }
  0x65   :  { %1260 = vmatmul.mubr.f32.gmra.mrb[14].mxu0 %v101_v56 }
  0xaa   :  { %v283_v58 = vpop.permute.xlu0 %282 }
  0xab   :  { %v293_v59 = vpop.permute.xlu1 %292  ;;  %v366_v2 = vadd.f32 %v1745_v62, %v283_v58 }
  0xac   :  { %v368_v7 = vadd.f32 %v1745_v62, %v293_v59 }
  0xae   :  { %v288_v60 = vpop.permute.xlu0 %287 }
  0xaf   :  { %v298_v61 = vpop.permute.xlu1 %297  ;;  %v367_v0 = vadd.f32 %v1745_v62, %v288_v60 }
  0xb0   :  { %v369_v11 = vadd.f32 %v1745_v62, %v298_v61 }
  0xb2   :  { %v303_v63 = vpop.permute.xlu0 %302 }
  0xb3   :  { %v308_v1 = vpop.permute.xlu1 %307  ;;  %v370_v17 = vadd.f32 %v1745_v62, %v303_v63 }
  0xb4   :  { %v371_v23 = vadd.f32 %v1745_v62, %v308_v1 }
  0xb6   :  { %v313_v4 = vpop.permute.xlu0 %312 }
  0xb7   :  { %v318_v9 = vpop.permute.xlu1 %317  ;;  %v372_v25 = vadd.f32 %v1745_v62, %v313_v4 }
  0xb8   :  { %v373_v32 = vadd.f32 %v1745_v62, %v318_v9 }
  0xba   :  { %v323_v16 = vpop.permute.xlu0 %322 }
  0xbb   :  { %v328_v21 = vpop.permute.xlu1 %327  ;;  %v374_v35 = vadd.f32 %v1745_v62, %v323_v16  ;;  %v766_v16 = vld [vmem:[#allocation7] sm:$0xff] }
  0xbc   :  { %v375_v41 = vadd.f32 %v1745_v62, %v328_v21 }
  0xbe   :  { %v333_v30 = vpop.permute.xlu0 %332 }
  0xbf   :  { %v338_v34 = vpop.permute.xlu1 %337  ;;  %v376_v44 = vadd.f32 %v1745_v62, %v333_v30 }
  0xc0   :  { %v377_v51 = vadd.f32 %v1745_v62, %v338_v34 }
  0xc2   :  { %v343_v43 = vpop.permute.xlu0 %342 }
  0xc3   :  { %v348_v49 = vpop.permute.xlu1 %347  ;;  %v378_v53 = vadd.f32 %v1745_v62, %v343_v43 }
  0xc4   :  { %v379_v60 = vadd.f32 %v1745_v62, %v348_v49  ;;  %v775_v49 = vld [vmem:[#allocation7 + $0x48] sm:$0xff] }
  0xc6   :  { %v353_v58 = vpop.permute.xlu0 %352 }
  0xc7   :  { %v358_v63 = vpop.permute.xlu1 %357 }
 0x11c   :  { %v1240_v3 = vpop.f32.mrb[0].mxu0 }
 0x11d   :  { %v1749_v5 = vadd.f32 %v1240_v3, %v367_v0  ;;  %v184_v6 = vpop.f32.mrb[1].mxu0  ;;  %v380_v0 = vadd.f32 %v1745_v62, %v353_v58  ;;  %v776_v58 = vld [vmem:[#allocation7 + $0x50] sm:$0xff] }
 0x11e   :  { %v1752_v8 = vadd.f32 %v366_v2, %v184_v6 }
 0x11f   :  { %v399_v10 = vmin.f32 %v1749_v5, 0.0 }
 0x120   :  { %v398_v12 = vmin.f32 %v1752_v8, 0.0  ;;  %v1243_v13 = vpop.f32.mrb[2].mxu0 }
 0x121   :  { %432 = vmax.xlane.f32.xlu1 %v399_v10  ;;  %v194_v14 = vpop.f32.mrb[3].mxu0  ;;  %v1764_v18 = vadd.f32 %v1243_v13, %v369_v11 }
 0x122   :  { %v1759_v15 = vadd.f32 %v368_v7, %v194_v14  ;;  %430 = vmax.xlane.f32.xlu0 %v398_v12  ;;  %v381_v7 = vadd.f32 %v1745_v62, %v358_v63  ;;  %v1866_v63 = vld [vmem:[#allocation3 + $0x20] sm:$0xff] }
 0x123   :  { %v401_v26 = vmin.f32 %v1764_v18, 0.0 }
 0x124   :  { %v400_v19 = vmin.f32 %v1759_v15, 0.0  ;;  %v1246_v20 = vpop.f32.mrb[4].mxu0 }
 0x125   :  { %v204_v22 = vpop.f32.mrb[5].mxu0  ;;  %v1774_v27 = vadd.f32 %v1246_v20, %v371_v23  ;;  %v768_v20 = vld [vmem:[#allocation7 + $0x10] sm:$0xff] }
 0x126   :  { %v1768_v24 = vadd.f32 %v370_v17, %v204_v22  ;;  %434 = vmax.xlane.f32.xlu0 %v400_v19  ;;  %v767_v17 = vld [vmem:[#allocation7 + $0x8] sm:$0xff]  ;;  %v769_v22 = vld [vmem:[#allocation7 + $0x18] sm:$0xff] }
 0x127   :  { %v403_v36 = vmin.f32 %v1774_v27, 0.0  ;;  %v1350_v21 = vpack.c.bf16 %v767_v17, %v766_v16  ;;  %v1354_v23 = vpack.c.bf16 %v769_v22, %v768_v20  ;;  %v778_v17 = vld [vmem:[#allocation7 + $0x60] sm:$0xff]  ;;  %v779_v20 = vld [vmem:[#allocation7 + $0x68] sm:$0xff]  ;;  %v1879_v22 = vld [vmem:[#allocation3 + $0x30] sm:$0xff] }
 0x128   :  { %v402_v28 = vmin.f32 %v1768_v24, 0.0  ;;  %v1249_v29 = vpop.f32.mrb[6].mxu0 }
 0x129   :  { %v214_v31 = vpop.f32.mrb[7].mxu0  ;;  %v1786_v37 = vadd.f32 %v1249_v29, %v373_v32  ;;  %v771_v29 = vld [vmem:[#allocation7 + $0x28] sm:$0xff]  ;;  %1351 = vmatprep.subr.bf16.mxu1 %v1350_v21  ;;  %v773_v32 = vld [vmem:[#allocation7 + $0x38] sm:$0xff] }
 0x12a   :  { %v1778_v33 = vadd.f32 %v372_v25, %v214_v31  ;;  %436 = vmax.xlane.f32.xlu0 %v401_v26  ;;  %438 = vmax.xlane.f32.xlu1 %v402_v28  ;;  %v770_v25 = vld [vmem:[#allocation7 + $0x20] sm:$0xff]  ;;  %v772_v31 = vld [vmem:[#allocation7 + $0x30] sm:$0xff] }
 0x12b   :  { %v405_v45 = vmin.f32 %v1786_v37, 0.0  ;;  %1353 = vmatpush3.bf16.msra.mxu1 %v1350_v21  ;;  %v1358_v30 = vpack.c.bf16 %v771_v29, %v770_v25  ;;  %v1362_v34 = vpack.c.bf16 %v773_v32, %v772_v31  ;;  %v1877_v21 = vld [vmem:[#allocation3 + $0x28] sm:$0xff]  ;;  %v780_v32 = vld [vmem:[#allocation7 + $0x70] sm:$0xff] }
 0x12c   :  { %v404_v38 = vmin.f32 %v1778_v33, 0.0  ;;  %v1252_v39 = vpop.f32.mrb[8].mxu0  ;;  %1355 = vmatprep.subr.bf16.mxu1 %v1354_v23 }
 0x12d   :  { %v224_v40 = vpop.f32.mrb[9].mxu0  ;;  %v1798_v46 = vadd.f32 %v1252_v39, %v375_v41  ;;  %v1845_v39 = vld [vmem:[#allocation3] sm:$0xff] }
 0x12e   :  { %v1790_v42 = vadd.f32 %v374_v35, %v224_v40  ;;  %440 = vmax.xlane.f32.xlu0 %v403_v36  ;;  %442 = vmax.xlane.f32.xlu1 %v404_v38  ;;  %v1843_v35 = vld [vmem:[#allocation3 + $0x8] sm:$0xff] }
 0x12f   :  { %v407_v54 = vmin.f32 %v1798_v46, 0.0  ;;  %1357 = vmatpush3.bf16.msra.mxu1 %v1354_v23  ;;  %v1374_v23 = vpack.c.bf16 %v779_v20, %v778_v17 }
 0x130   :  { %v406_v47 = vmin.f32 %v1790_v42, 0.0  ;;  %v1255_v48 = vpop.f32.mrb[10].mxu0  ;;  %1359 = vmatprep.subr.bf16.mxu1 %v1358_v30 }
 0x131   :  { %v234_v50 = vpop.f32.mrb[11].mxu0  ;;  %v1810_v55 = vadd.f32 %v1255_v48, %v377_v51  ;;  %v774_v48 = vld [vmem:[#allocation7 + $0x40] sm:$0xff] }
 0x132   :  { %v1802_v52 = vadd.f32 %v376_v44, %v234_v50  ;;  %444 = vmax.xlane.f32.xlu0 %v405_v45  ;;  %446 = vmax.xlane.f32.xlu1 %v406_v47  ;;  %v1856_v50 = vld [vmem:[#allocation3 + $0x10] sm:$0xff]  ;;  %v1366_v51 = vpack.c.bf16 %v775_v49, %v774_v48 }
 0x133   :  { %v409_v1 = vmin.f32 %v1810_v55, 0.0  ;;  %1361 = vmatpush3.bf16.msra.mxu1 %v1358_v30 }
 0x134   :  { %v408_v56 = vmin.f32 %v1802_v52, 0.0  ;;  %v1258_v57 = vpop.f32.mrb[12].mxu0  ;;  %1363 = vmatprep.subr.bf16.mxu1 %v1362_v34 }
 0x135   :  { %v244_v59 = vpop.f32.mrb[13].mxu0  ;;  %v1822_v2 = vadd.f32 %v1258_v57, %v379_v60  ;;  %v1864_v60 = vld [vmem:[#allocation3 + $0x18] sm:$0xff] }
 0x136   :  { %v1814_v61 = vadd.f32 %v378_v53, %v244_v59  ;;  %448 = vmax.xlane.f32.xlu0 %v407_v54  ;;  %450 = vmax.xlane.f32.xlu1 %v408_v56  ;;  %v777_v59 = vld [vmem:[#allocation7 + $0x58] sm:$0xff] }
 0x137   :  { %v411_v11 = vmin.f32 %v1822_v2, 0.0  ;;  %1365 = vmatpush3.bf16.msra.mxu1 %v1362_v34  ;;  %v781_v34 = vld [vmem:[#allocation7 + $0x78] sm:$0xff] }
 0x138   :  { %v410_v3 = vmin.f32 %v1814_v61, 0.0  ;;  %v1261_v4 = vpop.f32.mrb[14].mxu0  ;;  %1367 = vmatprep.subr.bf16.mxu1 %v1366_v51  ;;  %v1378_v48 = vpack.c.bf16 %v781_v34, %v780_v32 }
 0x139   :  { %v254_v6 = vpop.f32.mrb[15].mxu0  ;;  %v1833_v13 = vadd.f32 %v1261_v4, %v381_v7 }
 0x13a   :  { %v1826_v9 = vadd.f32 %v380_v0, %v254_v6  ;;  %452 = vmax.xlane.f32.xlu0 %v409_v1  ;;  %454 = vmax.xlane.f32.xlu1 %v410_v3  ;;  %v1370_v0 = vpack.c.bf16 %v777_v59, %v776_v58 }
 0x13b   :  { %v413_v62 = vmin.f32 %v1833_v13, 0.0  ;;  %1369 = vmatpush3.bf16.msra.mxu1 %v1366_v51  ;;  %v1568_v13 = vmov 4  }
 0x13c   :  { %v412_v14 = vmin.f32 %v1826_v9, 0.0  ;;  %1371 = vmatprep.subr.bf16.mxu1 %v1370_v0 }
 0x13e   :  { %456 = vmax.xlane.f32.xlu0 %v411_v11  ;;  %458 = vmax.xlane.f32.xlu1 %v412_v14 }
 0x13f   :  { %1373 = vmatpush3.bf16.msra.mxu1 %v1370_v0  ;;  %v1909_v0 = vld [vmem:[#allocation3 + $0x48] sm:$0xff] }
 0x140   :  { %1375 = vmatprep.subr.bf16.mxu1 %v1374_v23 }
 0x142   :  { %460 = vmax.xlane.f32.xlu0 %v413_v62 }
 0x143   :  { %1377 = vmatpush3.bf16.msra.mxu1 %v1374_v23 }
 0x144   :  { %1379 = vmatprep.subr.bf16.mxu1 %v1378_v48 }
 0x147   :  { %1381 = vmatpush3.bf16.msra.mxu1 %v1378_v48 }
 0x1ae   :  { %v433_v40 = vpop.xlane.xlu1 %432 }
 0x1af   :  { %v1848_v41 = vmax.f32 %v1843_v35, %v433_v40  ;;  %v431_v43 = vpop.xlane.xlu0 %430  ;;  %v1893_v40 = vld [vmem:[#allocation3 + $0x38] sm:$0xff] }
 0x1b0   :  { %v1851_v44 = vmax.f32 %v1845_v39, %v431_v43  ;;  %v1895_v43 = vld [vmem:[#allocation3 + $0x40] sm:$0xff] }
 0x1b1   :  { %961 = vst.msk [vmem:[#allocation3 + $0x8] sm:$0xff] %vm69_vm0, %v1848_v41  ;;  %533 = vperm.xlu0 %1390, %v1848_v41  }
 0x1b2   :  { %960 = vst.msk [vmem:[#allocation3] sm:$0xff] %vm69_vm0, %v1851_v44  ;;  %528 = vperm.xlu1 %1391, %v1851_v44   ;;  %v478_v49 = vsub.f32 %v1845_v39, %v1851_v44 }
 0x1b3   :  { %v435_v53 = vpop.xlane.xlu0 %434 }
 0x1b4   :  { %v1862_v57 = vmax.f32 %v1856_v50, %v435_v53  ;;  %v494_v39 = vmul.f32 1.442695, %v478_v49 }
 0x1b6   :  { %962 = vst.msk [vmem:[#allocation3 + $0x10] sm:$0xff] %vm69_vm0, %v1862_v57  ;;  %538 = vperm.xlu1 %1391, %v1862_v57   ;;  %v480_v44 = vsub.f32 %v1856_v50, %v1862_v57  ;;  %1394 = vpow2.f32 %v494_v39 }
 0x1b7   :  { %v437_v4 = vpop.xlane.xlu0 %436  ;;  %v439_v6 = vpop.xlane.xlu1 %438 }
 0x1b8   :  { %v1872_v7 = vmax.f32 %v1864_v60, %v437_v4  ;;  %v1875_v16 = vmax.f32 %v1866_v63, %v439_v6  ;;  %v1911_v4 = vld [vmem:[#allocation3 + $0x50] sm:$0xff]  ;;  %v479_v6 = vsub.f32 %v1843_v35, %v1848_v41  ;;  %v1925_v35 = vld [vmem:[#allocation3 + $0x58] sm:$0xff]  ;;  %v1927_v41 = vld [vmem:[#allocation3 + $0x60] sm:$0xff]  ;;  %v498_v50 = vmul.f32 1.442695, %v480_v44 }
 0x1ba   :  { %963 = vst.msk [vmem:[#allocation3 + $0x18] sm:$0xff] %vm69_vm0, %v1872_v7  ;;  %964 = vst.msk [vmem:[#allocation3 + $0x20] sm:$0xff] %vm69_vm0, %v1875_v16  ;;  %548 = vperm.xlu0 %1390, %v1875_v16   ;;  %543 = vperm.xlu1 %1391, %v1872_v7   ;;  %v481_v32 = vsub.f32 %v1864_v60, %v1872_v7  ;;  %v482_v57 = vsub.f32 %v1866_v63, %v1875_v16  ;;  %v427_v60 = vld [vmem:[#allocation3 + $0x68] sm:$0xff]  ;;  %v1939_v7 = vld [vmem:[#allocation3 + $0x70] sm:$0xff] }
 0x1bb   :  { %v441_v25 = vpop.xlane.xlu0 %440  ;;  %v443_v29 = vpop.xlane.xlu1 %442 }
 0x1bc   :  { %v1888_v30 = vmax.f32 %v1877_v21, %v441_v25  ;;  %v1891_v31 = vmax.f32 %v1879_v22, %v443_v29  ;;  %v496_v29 = vmul.f32 1.442695, %v479_v6  ;;  %v502_v63 = vmul.f32 1.442695, %v482_v57 }
 0x1be   :  { %965 = vst.msk [vmem:[#allocation3 + $0x28] sm:$0xff] %vm69_vm0, %v1888_v30  ;;  %966 = vst.msk [vmem:[#allocation3 + $0x30] sm:$0xff] %vm69_vm0, %v1891_v31  ;;  %558 = vperm.xlu0 %1390, %v1891_v31   ;;  %553 = vperm.xlu1 %1391, %v1888_v30   ;;  %1396 = vpow2.f32 %v496_v29  ;;  %v483_v6 = vsub.f32 %v1877_v21, %v1888_v30  ;;  %v484_v16 = vsub.f32 %v1879_v22, %v1891_v31  ;;  %v429_v29 = vld [vmem:[#allocation3 + $0x78] sm:$0xff] }
 0x1bf   :  { %v445_v51 = vpop.xlane.xlu0 %444  ;;  %v447_v53 = vpop.xlane.xlu1 %446  ;;  %1398 = vpow2.f32 %v498_v50 }
 0x1c0   :  { %v469_v58 = vmax.f32 %v1893_v40, %v445_v51  ;;  %v1907_v59 = vmax.f32 %v1895_v43, %v447_v53  ;;  %v500_v53 = vmul.f32 1.442695, %v481_v32  ;;  %v504_v32 = vmul.f32 1.442695, %v483_v6  ;;  %v1395_v57 = vpop.eup %1394 }
 0x1c1   :  { %v506_v30 = vmul.f32 1.442695, %v484_v16 }
 0x1c2   :  { %967 = vst.msk [vmem:[#allocation3 + $0x38] sm:$0xff] %vm69_vm0, %v469_v58  ;;  %968 = vst.msk [vmem:[#allocation3 + $0x40] sm:$0xff] %vm69_vm0, %v1907_v59  ;;  %568 = vperm.xlu0 %1390, %v1907_v59   ;;  %563 = vperm.xlu1 %1391, %v469_v58   ;;  %1400 = vpow2.f32 %v500_v53  ;;  %v485_v21 = vsub.f32 %v1893_v40, %v469_v58  ;;  %v486_v22 = vsub.f32 %v1895_v43, %v1907_v59 }
 0x1c3   :  { %v449_v17 = vpop.xlane.xlu0 %448  ;;  %v451_v20 = vpop.xlane.xlu1 %450  ;;  %1402 = vpow2.f32 %v502_v63 }
 0x1c4   :  { %v471_v23 = vmax.f32 %v1909_v0, %v449_v17  ;;  %v1923_v25 = vmax.f32 %v1911_v4, %v451_v20  ;;  %1404 = vpow2.f32 %v504_v32  ;;  %v510_v40 = vmul.f32 1.442695, %v486_v22 }
 0x1c5   :  { %1406 = vpow2.f32 %v506_v30 }
 0x1c6   :  { %969 = vst.msk [vmem:[#allocation3 + $0x48] sm:$0xff] %vm69_vm0, %v471_v23  ;;  %970 = vst.msk [vmem:[#allocation3 + $0x50] sm:$0xff] %vm69_vm0, %v1923_v25  ;;  %578 = vperm.xlu0 %1390, %v1923_v25   ;;  %573 = vperm.xlu1 %1391, %v471_v23   ;;  %v488_v58 = vsub.f32 %v1911_v4, %v1923_v25 }
 0x1c7   :  { %v453_v34 = vpop.xlane.xlu0 %452  ;;  %v455_v48 = vpop.xlane.xlu1 %454 }
 0x1c8   :  { %v473_v49 = vmax.f32 %v1925_v35, %v453_v34  ;;  %v474_v51 = vmax.f32 %v1927_v41, %v455_v48  ;;  %v508_v34 = vmul.f32 1.442695, %v485_v21  ;;  %v487_v48 = vsub.f32 %v1909_v0, %v471_v23  ;;  %v1397_v53 = vpop.eup %1396 }
 0x1c9   :  { %v1399_v6 = vpop.eup %1398  ;;  %v514_v63 = vmul.f32 1.442695, %v488_v58 }
 0x1ca   :  { %971 = vst.msk [vmem:[#allocation3 + $0x58] sm:$0xff] %vm69_vm0, %v473_v49  ;;  %972 = vst.msk [vmem:[#allocation3 + $0x60] sm:$0xff] %vm69_vm0, %v474_v51  ;;  %588 = vperm.xlu0 %1390, %v474_v51   ;;  %583 = vperm.xlu1 %1391, %v473_v49   ;;  %1408 = vpow2.f32 %v508_v34  ;;  %v512_v43 = vmul.f32 1.442695, %v487_v48  ;;  %v489_v59 = vsub.f32 %v1925_v35, %v473_v49 }
 0x1cb   :  { %v457_v39 = vpop.xlane.xlu0 %456  ;;  %v459_v44 = vpop.xlane.xlu1 %458  ;;  %1410 = vpow2.f32 %v510_v40  ;;  %v490_v0 = vsub.f32 %v1927_v41, %v474_v51 }
 0x1cc   :  { %v475_v17 = vmax.f32 %v427_v60, %v457_v39  ;;  %v476_v20 = vmax.f32 %v1939_v7, %v459_v44  ;;  %v1401_v23 = vpop.eup %1400  ;;  %1412 = vpow2.f32 %v512_v43  ;;  %v516_v39 = vmul.f32 1.442695, %v489_v59 }
 0x1cd   :  { %v1403_v16 = vpop.eup %1402  ;;  %1414 = vpow2.f32 %v514_v63  ;;  %v518_v4 = vmul.f32 1.442695, %v490_v0 }
 0x1ce   :  { %973 = vst.msk [vmem:[#allocation3 + $0x68] sm:$0xff] %vm69_vm0, %v475_v17  ;;  %974 = vst.msk [vmem:[#allocation3 + $0x70] sm:$0xff] %vm69_vm0, %v476_v20  ;;  %598 = vperm.xlu0 %1390, %v476_v20   ;;  %593 = vperm.xlu1 %1391, %v475_v17   ;;  %v491_v44 = vsub.f32 %v427_v60, %v475_v17  ;;  %v492_v25 = vsub.f32 %v1939_v7, %v476_v20  ;;  %v1405_v32 = vpop.eup %1404  ;;  %1416 = vpow2.f32 %v516_v39 }
 0x1cf   :  { %v461_v31 = vpop.xlane.xlu0 %460  ;;  %v1407_v21 = vpop.eup %1406  ;;  %1418 = vpow2.f32 %v518_v4 }
 0x1d0   :  { %v477_v50 = vmax.f32 %v429_v29, %v461_v31  ;;  %v520_v35 = vmul.f32 1.442695, %v491_v44  ;;  %v522_v49 = vmul.f32 1.442695, %v492_v25 }
 0x1d2   :  { %975 = vst.msk [vmem:[#allocation3 + $0x78] sm:$0xff] %vm69_vm0, %v477_v50  ;;  %603 = vperm.xlu1 %1391, %v477_v50   ;;  %672 = vperm.xlu0 %1390, %v1395_v57   ;;  %v493_v41 = vsub.f32 %v429_v29, %v477_v50  ;;  %1420 = vpow2.f32 %v520_v35 }
 0x1d3   :  { %1422 = vpow2.f32 %v522_v49 }
 0x1d4   :  { %v1409_v51 = vpop.eup %1408  ;;  %v524_v60 = vmul.f32 1.442695, %v493_v41 }
 0x1d5   :  { %v1411_v30 = vpop.eup %1410 }
 0x1d6   :  { %677 = vperm.xlu1 %1391, %v1397_v53   ;;  %682 = vperm.xlu0 %1390, %v1399_v6   ;;  %v1413_v17 = vpop.eup %1412  ;;  %1424 = vpow2.f32 %v524_v60 }
 0x1d7   :  { %v1415_v22 = vpop.eup %1414 }
 0x1d8   :  { %v1417_v7 = vpop.eup %1416 }
 0x1d9   :  { %v1419_v20 = vpop.eup %1418 }
 0x1da   :  { %687 = vperm.xlu1 %1391, %v1401_v23   ;;  %692 = vperm.xlu0 %1390, %v1403_v16  }
 0x1dc   :  { %v1421_v31 = vpop.eup %1420 }
 0x1dd   :  { %v1423_v57 = vpop.eup %1422 }
 0x1de   :  { %697 = vperm.xlu1 %1391, %v1405_v32   ;;  %702 = vperm.xlu0 %1390, %v1407_v21  }
 0x1e0   :  { %v1425_v29 = vpop.eup %1424 }
 0x1e2   :  { %707 = vperm.xlu1 %1391, %v1409_v51   ;;  %712 = vperm.xlu0 %1390, %v1411_v30  }
 0x1e6   :  { %717 = vperm.xlu1 %1391, %v1413_v17   ;;  %722 = vperm.xlu0 %1390, %v1415_v22  }
 0x1ea   :  { %727 = vperm.xlu1 %1391, %v1417_v7   ;;  %732 = vperm.xlu0 %1390, %v1419_v20  }
 0x1ee   :  { %737 = vperm.xlu1 %1391, %v1421_v31   ;;  %742 = vperm.xlu0 %1390, %v1423_v57  }
 0x1f2   :  { %747 = vperm.xlu1 %1391, %v1425_v29   ;;  %1393 = vset.pattern.permute.xlu0 %v1568_v13 }
 0x1f6   :  { %1392 = vset.pattern.permute.xlu1 %v1568_v13 }
 0x230   :  { %v534_v50 = vpop.permute.xlu0 %533 }
 0x231   :  { %v607_v34 = vsub.f32 %v399_v10, %v534_v50  ;;  %v529_v48 = vpop.permute.xlu1 %528 }
 0x232   :  { %v606_v40 = vsub.f32 %v398_v12, %v529_v48 }
 0x233   :  { %v624_v58 = vmul.f32 1.442695, %v607_v34 }
 0x234   :  { %v622_v53 = vmul.f32 1.442695, %v606_v40 }
 0x235   :  { %v539_v6 = vpop.permute.xlu1 %538 }
 0x236   :  { %1426 = vpow2.f32 %v622_v53  ;;  %v608_v43 = vsub.f32 %v400_v19, %v539_v6 }
 0x237   :  { %1428 = vpow2.f32 %v624_v58 }
 0x238   :  { %v626_v59 = vmul.f32 1.442695, %v608_v43 }
 0x239   :  { %v549_v63 = vpop.permute.xlu0 %548  ;;  %v544_v0 = vpop.permute.xlu1 %543 }
 0x23a   :  { %1430 = vpow2.f32 %v626_v59  ;;  %v610_v5 = vsub.f32 %v402_v28, %v549_v63  ;;  %v609_v10 = vsub.f32 %v401_v26, %v544_v0 }
 0x23c   :  { %v630_v8 = vmul.f32 1.442695, %v610_v5  ;;  %v628_v12 = vmul.f32 1.442695, %v609_v10 }
 0x23d   :  { %v559_v23 = vpop.permute.xlu0 %558  ;;  %v554_v16 = vpop.permute.xlu1 %553 }
 0x23e   :  { %1432 = vpow2.f32 %v630_v8  ;;  %v612_v15 = vsub.f32 %v404_v38, %v559_v23  ;;  %v611_v19 = vsub.f32 %v403_v36, %v554_v16 }
 0x23f   :  { %1434 = vpow2.f32 %v628_v12 }
 0x240   :  { %v1427_v39 = vpop.eup %1426  ;;  %v634_v44 = vmul.f32 1.442695, %v612_v15  ;;  %v632_v4 = vmul.f32 1.442695, %v611_v19 }
 0x241   :  { %v1429_v24 = vpop.eup %1428  ;;  %v569_v28 = vpop.permute.xlu0 %568  ;;  %1294 = vmatprep.mubr.f32.mxu1 %v1427_v39 }
 0x242   :  { %v564_v18 = vpop.permute.xlu1 %563  ;;  %1436 = vpow2.f32 %v634_v44  ;;  %v614_v26 = vsub.f32 %v406_v47, %v569_v28  ;;  %1295 = vmatmul.mubr.f32.vlgmr.msra.gmra.mrb[0].mxu1 %v1429_v24 }
 0x243   :  { %v613_v25 = vsub.f32 %v405_v45, %v564_v18  ;;  %1438 = vpow2.f32 %v632_v4 }
 0x244   :  { %v1431_v33 = vpop.eup %1430  ;;  %v638_v27 = vmul.f32 1.442695, %v614_v26 }
 0x245   :  { %v636_v36 = vmul.f32 1.442695, %v613_v25  ;;  %v579_v38 = vpop.permute.xlu0 %578  ;;  %1297 = vmatprep.mubr.f32.mxu1 %v1431_v33 }
 0x246   :  { %v574_v32 = vpop.permute.xlu1 %573  ;;  %1440 = vpow2.f32 %v638_v27  ;;  %v616_v21 = vsub.f32 %v408_v56, %v579_v38 }
 0x247   :  { %v615_v35 = vsub.f32 %v407_v54, %v574_v32  ;;  %1442 = vpow2.f32 %v636_v36 }
 0x248   :  { %v1433_v42 = vpop.eup %1432  ;;  %v642_v47 = vmul.f32 1.442695, %v616_v21 }
 0x249   :  { %v640_v37 = vmul.f32 1.442695, %v615_v35  ;;  %v1435_v45 = vpop.eup %1434  ;;  %v589_v49 = vpop.permute.xlu0 %588 }
 0x24a   :  { %v584_v41 = vpop.permute.xlu1 %583  ;;  %1444 = vpow2.f32 %v642_v47  ;;  %v618_v51 = vsub.f32 %v410_v3, %v589_v49  ;;  %1298 = vmatmul.mubr.f32.gmra.mrb[2].mxu1 %v1435_v45 }
 0x24b   :  { %v617_v30 = vsub.f32 %v409_v1, %v584_v41  ;;  %1446 = vpow2.f32 %v640_v37  ;;  %1300 = vmatprep.mubr.f32.mxu1 %v1433_v42 }
 0x24c   :  { %v1437_v52 = vpop.eup %1436  ;;  %v646_v46 = vmul.f32 1.442695, %v618_v51 }
 0x24d   :  { %v644_v54 = vmul.f32 1.442695, %v617_v30  ;;  %v1439_v56 = vpop.eup %1438  ;;  %v599_v60 = vpop.permute.xlu0 %598 }
 0x24e   :  { %v594_v17 = vpop.permute.xlu1 %593  ;;  %1448 = vpow2.f32 %v646_v46  ;;  %v620_v22 = vsub.f32 %v412_v14, %v599_v60  ;;  %1301 = vmatmul.mubr.f32.gmra.mrb[4].mxu1 %v1439_v56 }
 0x24f   :  { %v619_v61 = vsub.f32 %v411_v11, %v594_v17  ;;  %1450 = vpow2.f32 %v644_v54  ;;  %1303 = vmatprep.mubr.f32.mxu1 %v1437_v52 }
 0x250   :  { %v1441_v55 = vpop.eup %1440  ;;  %v650_v1 = vmul.f32 1.442695, %v620_v22 }
 0x251   :  { %v648_v3 = vmul.f32 1.442695, %v619_v61  ;;  %v1443_v7 = vpop.eup %1442  ;;  %v673_v48 = vpop.permute.xlu0 %672 }
 0x252   :  { %v604_v20 = vpop.permute.xlu1 %603  ;;  %1452 = vpow2.f32 %v650_v1  ;;  %1304 = vmatmul.mubr.f32.gmra.mrb[6].mxu1 %v1443_v7  ;;  %v750_v59 = vmul.f32 0.0, %v673_v48 }
 0x253   :  { %v621_v31 = vsub.f32 %v413_v62, %v604_v20  ;;  %1454 = vpow2.f32 %v648_v3  ;;  %1306 = vmatprep.mubr.f32.mxu1 %v1441_v55 }
 0x254   :  { %v1445_v9 = vpop.eup %1444 }
 0x255   :  { %v652_v14 = vmul.f32 1.442695, %v621_v31  ;;  %v1447_v57 = vpop.eup %1446  ;;  %v683_v58 = vpop.permute.xlu0 %682 }
 0x256   :  { %1307 = vmatmul.mubr.f32.gmra.mrb[8].mxu1 %v1447_v57  ;;  %v678_v62 = vpop.permute.xlu1 %677  ;;  %v752_v16 = vmul.f32 0.0, %v683_v58 }
 0x257   :  { %1456 = vpow2.f32 %v652_v14  ;;  %1309 = vmatprep.mubr.f32.mxu1 %v1445_v9  ;;  %v751_v6 = vmul.f32 0.0, %v678_v62 }
 0x258   :  { %v1449_v2 = vpop.eup %1448 }
 0x259   :  { %v1451_v11 = vpop.eup %1450  ;;  %v693_v43 = vpop.permute.xlu0 %692 }
 0x25a   :  { %1310 = vmatmul.mubr.f32.gmra.mrb[10].mxu1 %v1451_v11  ;;  %v688_v40 = vpop.permute.xlu1 %687  ;;  %v754_v18 = vmul.f32 0.0, %v693_v43 }
 0x25b   :  { %1312 = vmatprep.mubr.f32.mxu1 %v1449_v2  ;;  %v753_v23 = vmul.f32 0.0, %v688_v40 }
 0x25c   :  { %v1453_v29 = vpop.eup %1452 }
 0x25d   :  { %v1455_v50 = vpop.eup %1454  ;;  %v703_v12 = vpop.permute.xlu0 %702 }
 0x25e   :  { %1313 = vmatmul.mubr.f32.gmra.mrb[12].mxu1 %v1455_v50  ;;  %v698_v53 = vpop.permute.xlu1 %697  ;;  %v756_v38 = vmul.f32 0.0, %v703_v12 }
 0x25f   :  { %1315 = vmatprep.mubr.f32.mxu1 %v1453_v29  ;;  %v755_v24 = vmul.f32 0.0, %v698_v53 }
 0x261   :  { %v1457_v34 = vpop.eup %1456  ;;  %v713_v28 = vpop.permute.xlu0 %712 }
 0x262   :  { %1316 = vmatmul.mubr.f32.gmra.mrb[14].mxu1 %v1457_v34  ;;  %v708_v8 = vpop.permute.xlu1 %707  ;;  %v758_v49 = vmul.f32 0.0, %v713_v28 }
 0x263   :  { %v757_v36 = vmul.f32 0.0, %v708_v8 }
 0x265   :  { %v723_v35 = vpop.permute.xlu0 %722 }
 0x266   :  { %v718_v44 = vpop.permute.xlu1 %717  ;;  %v760_v60 = vmul.f32 0.0, %v723_v35 }
 0x267   :  { %v759_v45 = vmul.f32 0.0, %v718_v44 }
 0x269   :  { %v733_v56 = vpop.permute.xlu0 %732 }
 0x26a   :  { %v728_v32 = vpop.permute.xlu1 %727  ;;  %v762_v3 = vmul.f32 0.0, %v733_v56 }
 0x26b   :  { %v761_v54 = vmul.f32 0.0, %v728_v32 }
 0x26d   :  { %v743_v31 = vpop.permute.xlu0 %742 }
 0x26e   :  { %v738_v52 = vpop.permute.xlu1 %737  ;;  %v764_v11 = vmul.f32 0.0, %v743_v31 }
 0x26f   :  { %v763_v1 = vmul.f32 0.0, %v738_v52 }
 0x272   :  { %v748_v7 = vpop.permute.xlu1 %747 }
 0x273   :  { %v765_v2 = vmul.f32 0.0, %v748_v7 }
 0x315   :  { %v1296_v63 = vpop.f32.mrb[0].mxu1 }
 0x316   :  { %v1992_v0 = vadd.f32 %v1296_v63, %v751_v6  ;;  %v848_v5 = vpop.f32.mrb[1].mxu1 }
 0x317   :  { %v1994_v10 = vadd.f32 %v848_v5, %v750_v59 }
 0x318   :  { %1002 = vperm.xlu1 %1392, %v1992_v0  }
 0x319   :  { %997 = vperm.xlu0 %1393, %v1994_v10  }
 0x31d   :  { %v1299_v15 = vpop.f32.mrb[2].mxu1 }
 0x31e   :  { %v1998_v19 = vadd.f32 %v1299_v15, %v753_v23  ;;  %v858_v39 = vpop.f32.mrb[3].mxu1 }
 0x31f   :  { %v2000_v4 = vadd.f32 %v858_v39, %v752_v16 }
 0x320   :  { %1012 = vperm.xlu0 %1393, %v1998_v19  }
 0x321   :  { %v1302_v26 = vpop.f32.mrb[4].mxu1  ;;  %1007 = vperm.xlu1 %1392, %v2000_v4  }
 0x322   :  { %v2004_v25 = vadd.f32 %v1302_v26, %v755_v24  ;;  %v868_v33 = vpop.f32.mrb[5].mxu1 }
 0x323   :  { %v2006_v27 = vadd.f32 %v868_v33, %v754_v18 }
 0x324   :  { %1022 = vperm.xlu0 %1393, %v2004_v25  }
 0x325   :  { %v1305_v21 = vpop.f32.mrb[6].mxu1  ;;  %1017 = vperm.xlu1 %1392, %v2006_v27  }
 0x326   :  { %v2010_v42 = vadd.f32 %v1305_v21, %v757_v36  ;;  %v878_v47 = vpop.f32.mrb[7].mxu1 }
 0x327   :  { %v2012_v37 = vadd.f32 %v878_v47, %v756_v38 }
 0x328   :  { %1032 = vperm.xlu0 %1393, %v2010_v42  }
 0x329   :  { %v1308_v41 = vpop.f32.mrb[8].mxu1  ;;  %1027 = vperm.xlu1 %1392, %v2012_v37  }
 0x32a   :  { %v2016_v51 = vadd.f32 %v1308_v41, %v759_v45  ;;  %v888_v30 = vpop.f32.mrb[9].mxu1 }
 0x32b   :  { %v2018_v46 = vadd.f32 %v888_v30, %v758_v49 }
 0x32c   :  { %1042 = vperm.xlu0 %1393, %v2016_v51  }
 0x32d   :  { %v1311_v17 = vpop.f32.mrb[10].mxu1  ;;  %1037 = vperm.xlu1 %1392, %v2018_v46  }
 0x32e   :  { %v2022_v22 = vadd.f32 %v1311_v17, %v761_v54  ;;  %v898_v61 = vpop.f32.mrb[11].mxu1 }
 0x32f   :  { %v2024_v55 = vadd.f32 %v898_v61, %v760_v60 }
 0x330   :  { %1052 = vperm.xlu0 %1393, %v2022_v22  }
 0x331   :  { %v1314_v20 = vpop.f32.mrb[12].mxu1  ;;  %1047 = vperm.xlu1 %1392, %v2024_v55  }
 0x332   :  { %v2028_v9 = vadd.f32 %v1314_v20, %v763_v1  ;;  %v908_v14 = vpop.f32.mrb[13].mxu1 }
 0x333   :  { %v2030_v57 = vadd.f32 %v908_v14, %v762_v3 }
 0x334   :  { %1062 = vperm.xlu0 %1393, %v2028_v9  }
 0x335   :  { %v1317_v29 = vpop.f32.mrb[14].mxu1  ;;  %1057 = vperm.xlu1 %1392, %v2030_v57  }
 0x336   :  { %v2034_v50 = vadd.f32 %v1317_v29, %v765_v2  ;;  %v918_v34 = vpop.f32.mrb[15].mxu1 }
 0x337   :  { %v2036_v13 = vadd.f32 %v918_v34, %v764_v11 }
 0x338   :  { %1072 = vperm.xlu0 %1393, %v2034_v50  }
 0x339   :  { %1067 = vperm.xlu1 %1392, %v2036_v13  }
 0x397   :  { %v1003_v62 = vpop.permute.xlu1 %1002 }
 0x398   :  { %1458 = vrcp.f32 %v1003_v62  ;;  %v998_v48 = vpop.permute.xlu0 %997 }
 0x399   :  { %1460 = vrcp.f32 %v998_v48 }
 0x39f   :  { %v1013_v40 = vpop.permute.xlu0 %1012 }
 0x3a0   :  { %1462 = vrcp.f32 %v1013_v40  ;;  %v1008_v58 = vpop.permute.xlu1 %1007 }
 0x3a1   :  { %1464 = vrcp.f32 %v1008_v58 }
 0x3a2   :  { %v1459_v53 = vpop.eup %1458 }
 0x3a3   :  { %v1461_v6 = vpop.eup %1460  ;;  %v1078_v43 = vmul.f32 %v1459_v53, %v1992_v0  ;;  %v1023_v59 = vpop.permute.xlu0 %1022 }
 0x3a4   :  { %v1076_v63 = vmul.f32 %v1461_v6, %v1994_v10  ;;  %1466 = vrcp.f32 %v1023_v59  ;;  %v1018_v5 = vpop.permute.xlu1 %1017 }
 0x3a5   :  { %1108 = vst [vmem:[#allocation9 + $0x8] sm:$0xff] %v1078_v43  ;;  %1468 = vrcp.f32 %v1018_v5 }
 0x3a6   :  { %1107 = vst [vmem:[#allocation9] sm:$0xff] %v1076_v63 }
 0x3a7   :  { %v1033_v8 = vpop.permute.xlu0 %1032 }
 0x3a8   :  { %1470 = vrcp.f32 %v1033_v8  ;;  %v1028_v12 = vpop.permute.xlu1 %1027 }
 0x3a9   :  { %1472 = vrcp.f32 %v1028_v12 }
 0x3aa   :  { %v1463_v23 = vpop.eup %1462 }
 0x3ab   :  { %v1465_v16 = vpop.eup %1464  ;;  %v1082_v15 = vmul.f32 %v1463_v23, %v1998_v19  ;;  %v1043_v39 = vpop.permute.xlu0 %1042 }
 0x3ac   :  { %v1080_v44 = vmul.f32 %v1465_v16, %v2000_v4  ;;  %1474 = vrcp.f32 %v1043_v39  ;;  %v1038_v0 = vpop.permute.xlu1 %1037 }
 0x3ad   :  { %1110 = vst [vmem:[#allocation9 + $0x18] sm:$0xff] %v1082_v15  ;;  %1476 = vrcp.f32 %v1038_v0 }
 0x3ae   :  { %v1467_v10 = vpop.eup %1466  ;;  %1109 = vst [vmem:[#allocation9 + $0x10] sm:$0xff] %v1080_v44 }
 0x3af   :  { %v1469_v24 = vpop.eup %1468  ;;  %v1086_v28 = vmul.f32 %v1467_v10, %v2004_v25  ;;  %v1053_v18 = vpop.permute.xlu0 %1052 }
 0x3b0   :  { %v1084_v26 = vmul.f32 %v1469_v24, %v2006_v27  ;;  %1478 = vrcp.f32 %v1053_v18  ;;  %v1048_v33 = vpop.permute.xlu1 %1047 }
 0x3b1   :  { %1112 = vst [vmem:[#allocation9 + $0x28] sm:$0xff] %v1086_v28  ;;  %1480 = vrcp.f32 %v1048_v33 }
 0x3b2   :  { %v1471_v19 = vpop.eup %1470  ;;  %1111 = vst [vmem:[#allocation9 + $0x20] sm:$0xff] %v1084_v26 }
 0x3b3   :  { %v1473_v36 = vpop.eup %1472  ;;  %v1090_v4 = vmul.f32 %v1471_v19, %v2010_v42  ;;  %v1063_v38 = vpop.permute.xlu0 %1062 }
 0x3b4   :  { %v1088_v32 = vmul.f32 %v1473_v36, %v2012_v37  ;;  %1482 = vrcp.f32 %v1063_v38  ;;  %v1058_v21 = vpop.permute.xlu1 %1057 }
 0x3b5   :  { %1114 = vst [vmem:[#allocation9 + $0x38] sm:$0xff] %v1090_v4  ;;  %1484 = vrcp.f32 %v1058_v21 }
 0x3b6   :  { %v1475_v25 = vpop.eup %1474  ;;  %1113 = vst [vmem:[#allocation9 + $0x30] sm:$0xff] %v1088_v32 }
 0x3b7   :  { %v1477_v35 = vpop.eup %1476  ;;  %v1094_v27 = vmul.f32 %v1475_v25, %v2016_v51  ;;  %v1073_v47 = vpop.permute.xlu0 %1072 }
 0x3b8   :  { %v1092_v45 = vmul.f32 %v1477_v35, %v2018_v46  ;;  %1486 = vrcp.f32 %v1073_v47  ;;  %v1068_v49 = vpop.permute.xlu1 %1067 }
 0x3b9   :  { %1116 = vst [vmem:[#allocation9 + $0x48] sm:$0xff] %v1094_v27  ;;  %1488 = vrcp.f32 %v1068_v49 }
 0x3ba   :  { %v1479_v42 = vpop.eup %1478  ;;  %1115 = vst [vmem:[#allocation9 + $0x40] sm:$0xff] %v1092_v45 }
 0x3bb   :  { %v1481_v41 = vpop.eup %1480  ;;  %v1098_v37 = vmul.f32 %v1479_v42, %v2022_v22 }
 0x3bc   :  { %v1096_v30 = vmul.f32 %v1481_v41, %v2024_v55 }
 0x3bd   :  { %1118 = vst [vmem:[#allocation9 + $0x58] sm:$0xff] %v1098_v37 }
 0x3be   :  { %v1483_v52 = vpop.eup %1482  ;;  %1117 = vst [vmem:[#allocation9 + $0x50] sm:$0xff] %v1096_v30 }
 0x3bf   :  { %v1485_v54 = vpop.eup %1484  ;;  %v1102_v51 = vmul.f32 %v1483_v52, %v2028_v9 }
 0x3c0   :  { %v1100_v56 = vmul.f32 %v1485_v54, %v2030_v57 }
 0x3c1   :  { %1120 = vst [vmem:[#allocation9 + $0x68] sm:$0xff] %v1102_v51 }
 0x3c2   :  { %v1487_v46 = vpop.eup %1486  ;;  %1119 = vst [vmem:[#allocation9 + $0x60] sm:$0xff] %v1100_v56 }
 0x3c3   :  { %v1489_v60 = vpop.eup %1488  ;;  %v1106_v17 = vmul.f32 %v1487_v46, %v2034_v50 }
 0x3c4   :  { %v1104_v22 = vmul.f32 %v1489_v60, %v2036_v13 }
 0x3c5   :  { %1122 = vst [vmem:[#allocation9 + $0x78] sm:$0xff] %v1106_v17 }
 0x3c6   :  { %1121 = vst [vmem:[#allocation9 + $0x70] sm:$0xff] %v1104_v22 }
 0x3c7   :  { %1545 = shalt.err (!%p1542_p6)
}
 0x3c8   :  { %s1546_s12 = scalar_lea.hbm %s2076_s5, 2048 }
 0x3c9   :  { %p1547_p7 = scmp.ne.s32.totalorder %s2076_s5, %s1546_s12  ;;  %p1550_p8 = scmp.lt.u32.totalorder %s1546_s12, %s2076_s5 }
 0x3cb   :  { %p1552_p9 = pnand %p1550_p8, %p1547_p7 }
 0x3cd   :  { %1555 = shalt.err (!%p1552_p9)
}
 0x3ce   :  { %1134 = dma.vmem_to_hbm [thread:$0]  %s1129_s8, 2048, %s2076_s5, [#allocation6], %s1563_s28, %s1563_s28, %s1564_s29  }
 0x3cf   :  { %1560 = dma.done.wait [#allocation6], 2048  }
 0x3d0   :  { %1561 = vsyncadd [#allocation6], 4294965248 }
 0x3d1   :  { %1138 = vsyncpa [#allocation5], 1 }
 0x3d2   :  { %1139 = vsyncpa [#allocation8], 1 }
 0x3d3   :  { %1140 = vsyncpa [#allocation6], 1 }

</bundles_post_ra>
